<compile_context>
chip_gen: v6e
topology: v6e:2x2x1
jax: 0.10.0
libtpu: 0.0.40
codegen_flags: <defaults>
</compile_context>

<pallas_src>
import jax
import jax.numpy as jnp
from jax.experimental import pallas as pl
from jax.experimental.pallas import tpu as pltpu

HIDDEN = 64                 # true hidden width fixed by the module definition
HIDDEN_PAD = 128            # zero-padded hidden width (full vreg lanes); col 64 = bias lane
_BIAS_COL = HIDDEN          # hidden column carrying the constant 1.0 for the b2 fold
_FASTPATH_MAX_B = 64        # below this batch, plain XLA beats kernel launch + DMA setup
_X_TILE_BYTES_CAP = 8 * 1024 * 1024   # cap on a single x tile (per buffer) in VMEM


def _round_up(n, m):
    return ((n + m - 1) // m) * m


def pack_params(w1, b1, w2, b2):
    """Pad/pack parameters once at init (hoisted out of the per-call forward).

    w1: (D, 64), b1: (64,), w2: (64, 1), b2: (1,)  (weights pre-transposed to (in, out)).
    Returns (w1_p (D,128), b1_p (1,128), w2row_p (1,128)) with b2 folded into w2row via a
    constant-1 hidden column: b1_p[:, 64] = 1.0 (ReLU(1)=1), w2row_p[:, 64] = b2.
    """
    D = w1.shape[0]
    f32 = jnp.float32
    w1_p = jnp.zeros((D, HIDDEN_PAD), f32).at[:, :HIDDEN].set(w1.astype(f32))
    b1_p = (jnp.zeros((1, HIDDEN_PAD), f32)
            .at[0, :HIDDEN].set(b1.astype(f32))
            .at[0, _BIAS_COL].set(1.0))
    w2_p = (jnp.zeros((1, HIDDEN_PAD), f32)
            .at[0, :HIDDEN].set(w2[:, 0].astype(f32))
            .at[0, _BIAS_COL].set(b2[0].astype(f32)))
    return w1_p, b1_p, w2_p


def mlp_kernel(x_ref, w1_ref, b1_ref, w2_ref, o_ref):
    # One (TB, D) batch tile:   Linear -> ReLU -> Linear (+ folded b2).
    h = jnp.dot(x_ref[...], w1_ref[...], preferred_element_type=jnp.float32)  # MXU (TB,128)
    h = jnp.maximum(h + b1_ref[...], 0.0)                                     # VPU, col 64 -> 1.0
    # Second layer as VPU multiply + XLU lane reduction; column 64 contributes 1.0*b2.
    o = jnp.sum(h * w2_ref[...], axis=-1, keepdims=True)                      # (TB, 1)
    o_ref[...] = o.astype(o_ref.dtype)                                        # narrow 4 B/row store


def neuralnet_forward(x, w1_p, b1_p, w2_p, *, tb=1024):
    """x: (B, D) f32; packed params from pack_params(). Returns (B,) f32 (the .squeeze(1))."""
    B, D = x.shape
    assert w1_p.shape == (D, HIDDEN_PAD)

    # Tiny batches: the kernel is pure launch/DMA overhead -> plain XLA, same math.
    if B < _FASTPATH_MAX_B:
        h = jnp.maximum(x @ w1_p + b1_p, 0.0)
        return jnp.sum(h * w2_p, axis=-1)

    # --- batch tile: multiple of 8, capped by per-buffer VMEM budget, no padding of x ----
    tb_vmem_cap = max(8, (_X_TILE_BYTES_CAP // (D * 4)) // 8 * 8)
    TB = max(8, min(tb, _round_up(B, 8), tb_vmem_cap))
    # Ensure >= 2 grid tiles when B is large enough so v7x's 2 TensorCores both get work.
    if pl.cdiv(B, TB) < 2 and B >= 2 * _FASTPATH_MAX_B:
        TB = max(8, _round_up(pl.cdiv(B, 2), 8))
    num_tiles = pl.cdiv(B, TB)   # ragged last tile handled by Pallas partial-block clipping

    # --- explicit VMEM budget (double-buffered x/out tiles + resident padded weights) ----
    xbuf = TB * D * 4
    obuf = TB * 1 * 4
    wbuf = (D * HIDDEN_PAD + 2 * HIDDEN_PAD) * 4
    vmem_need = 2 * (xbuf + obuf + wbuf)
    vmem_limit = int(min(32 * 1024 * 1024, max(4 * 1024 * 1024, 2 * vmem_need)))

    cost = pl.CostEstimate(
        flops=2 * B * D * HIDDEN + 2 * B * HIDDEN,          # true useful flops
        transcendentals=0,
        bytes_accessed=(B * D                                # x read
                        + D * HIDDEN_PAD + 2 * HIDDEN_PAD    # packed params actually moved
                        + B) * 4,                            # (B,1) output write
    )

    out2d = pl.pallas_call(
        mlp_kernel,
        out_shape=jax.ShapeDtypeStruct((B, 1), x.dtype),
        grid=(num_tiles,),
        in_specs=[
            pl.BlockSpec((TB, D), lambda i: (i, 0)),              # x: tiled over batch
            pl.BlockSpec((D, HIDDEN_PAD), lambda i: (0, 0)),      # W1: resident
            pl.BlockSpec((1, HIDDEN_PAD), lambda i: (0, 0)),      # b1 (+ bias lane): resident
            pl.BlockSpec((1, HIDDEN_PAD), lambda i: (0, 0)),      # w2 row (+ folded b2): resident
        ],
        out_specs=pl.BlockSpec((TB, 1), lambda i: (i, 0)),        # narrow (4 B/row) output
        compiler_params=pltpu.CompilerParams(
            dimension_semantics=("parallel",),
            vmem_limit_bytes=vmem_limit),
        cost_estimate=cost,
    )(x, w1_p, b1_p, w2_p)

    return out2d[:, 0]   # .squeeze(1) semantics


if __name__ == "__main__":
    BATCH = 500          # not a multiple of the tile: exercises ragged-last-block clipping
    INPUT_DIM = 32

    key = jax.random.PRNGKey(0)
    kx, kw1, kb1, kw2, kb2 = jax.random.split(key, 5)

    # Deterministic init mirroring torch.nn.Linear default U(-1/sqrt(fan_in), +1/sqrt(fan_in)),
    # weights stored pre-transposed as (in_features, out_features).
    bound1 = 1.0 / jnp.sqrt(jnp.float32(INPUT_DIM))
    bound2 = 1.0 / jnp.sqrt(jnp.float32(HIDDEN))
    w1 = jax.random.uniform(kw1, (INPUT_DIM, HIDDEN), jnp.float32, -bound1, bound1)
    b1 = jax.random.uniform(kb1, (HIDDEN,), jnp.float32, -bound1, bound1)
    w2 = jax.random.uniform(kw2, (HIDDEN, 1), jnp.float32, -bound2, bound2)
    b2 = jax.random.uniform(kb2, (1,), jnp.float32, -bound2, bound2)

    params = pack_params(w1, b1, w2, b2)   # padding done once, not per forward call
    fwd = jax.jit(neuralnet_forward)

    # --- Pallas path (B >= _FASTPATH_MAX_B) --------------------------------------------
    x = jax.random.normal(kx, (BATCH, INPUT_DIM), jnp.float32)
    pred = jax.block_until_ready(fwd(x, *params))

    ref = (jnp.maximum(x @ w1 + b1, 0.0) @ w2 + b2)[:, 0]   # pure-JAX reference forward
    assert pred.shape == (BATCH,), pred.shape
    assert jnp.allclose(pred, ref, atol=1e-5, rtol=1e-5), float(jnp.max(jnp.abs(pred - ref)))

    # --- tiny-batch XLA fast path (same math, no kernel launch) -------------------------
    x_small = jax.random.normal(kx, (8, INPUT_DIM), jnp.float32)
    pred_small = jax.block_until_ready(fwd(x_small, *params))
    ref_small = (jnp.maximum(x_small @ w1 + b1, 0.0) @ w2 + b2)[:, 0]
    assert pred_small.shape == (8,)
    assert jnp.allclose(pred_small, ref_small, atol=1e-5, rtol=1e-5)

    print("KERNEL_OK")
</pallas_src>

<mosaic_0001>
module attributes {stable_mosaic.version = 11 : i64} {
  func.func @mlp_kernel(%arg0: i32, %arg1: memref<256x32xf32, #tpu.memory_space<vmem>>, %arg2: memref<32x128xf32, #tpu.memory_space<vmem>>, %arg3: memref<1x128xf32, #tpu.memory_space<vmem>>, %arg4: memref<1x128xf32, #tpu.memory_space<vmem>>, %arg5: memref<256x1xf32, #tpu.memory_space<vmem>>) attributes {dimension_semantics = [#tpu.dimension_semantics<parallel>], iteration_bounds = array<i64: 2>, scalar_prefetch = 0 : i64, scratch_operands = 0 : i64, tpu.core_type = #tpu.core_type<tc>, window_params = [{transform_indices = @transform_0, window_bounds = array<i64: 256, 32>}, {pipeline_mode = #tpu.pipeline_mode<synchronous>, transform_indices = @transform_1, window_bounds = array<i64: 32, 128>}, {pipeline_mode = #tpu.pipeline_mode<synchronous>, transform_indices = @transform_2, window_bounds = array<i64: 1, 128>}, {pipeline_mode = #tpu.pipeline_mode<synchronous>, transform_indices = @transform_3, window_bounds = array<i64: 1, 128>}, {transform_indices = @transform_4, window_bounds = array<i64: 256, 1>}]} {
    %c0 = arith.constant 0 : index
    %c0_0 = arith.constant 0 : index
    %0 = vector.load %arg1[%c0, %c0_0] : memref<256x32xf32, #tpu.memory_space<vmem>>, vector<256x32xf32>
    %c0_1 = arith.constant 0 : index
    %c0_2 = arith.constant 0 : index
    %1 = vector.load %arg2[%c0_1, %c0_2] : memref<32x128xf32, #tpu.memory_space<vmem>>, vector<32x128xf32>
    %cst = arith.constant dense<0.000000e+00> : vector<256x128xf32>
    %2 = tpu.matmul %0, %1, %cst {dimension_numbers = #tpu.dot_dimension_numbers<[1], [0], [0], [1], [0, 0, 1, 1], [], []>} : vector<256x32xf32>, vector<32x128xf32>, vector<256x128xf32> -> vector<256x128xf32>
    %c0_3 = arith.constant 0 : index
    %c0_4 = arith.constant 0 : index
    %3 = vector.load %arg3[%c0_3, %c0_4] : memref<1x128xf32, #tpu.memory_space<vmem>>, vector<1x128xf32>
    %4 = vector.broadcast %3 : vector<1x128xf32> to vector<256x128xf32>
    %5 = arith.addf %2, %4 : vector<256x128xf32>
    %cst_5 = arith.constant 0.000000e+00 : f32
    %6 = vector.broadcast %cst_5 : f32 to vector<256x128xf32>
    %7 = arith.maximumf %5, %6 : vector<256x128xf32>
    %c0_6 = arith.constant 0 : index
    %c0_7 = arith.constant 0 : index
    %8 = vector.load %arg4[%c0_6, %c0_7] : memref<1x128xf32, #tpu.memory_space<vmem>>, vector<1x128xf32>
    %9 = vector.broadcast %8 : vector<1x128xf32> to vector<256x128xf32>
    %10 = arith.mulf %7, %9 : vector<256x128xf32>
    %cst_8 = arith.constant dense<0.000000e+00> : vector<256xf32>
    %11 = vector.multi_reduction <add>, %10, %cst_8 [1] : vector<256x128xf32> to vector<256xf32>
    %12 = vector.shape_cast %11 : vector<256xf32> to vector<256x1xf32>
    %c0_9 = arith.constant 0 : index
    %c0_10 = arith.constant 0 : index
    %13 = vector.load %arg5[%c0_9, %c0_10] : memref<256x1xf32, #tpu.memory_space<vmem>>, vector<256x1xf32>
    tpu.vector_store %arg5[%c0_9, %c0_10], %12 {strides = array<i32>} : memref<256x1xf32, #tpu.memory_space<vmem>>, vector<256x1xf32>,
    return
  }
  func.func @transform_0(%arg0: i32) -> (i32, i32) {
    %c0_i32 = arith.constant 0 : i32
    %c0_i32_0 = arith.constant 0 : i32
    return %arg0, %c0_i32 : i32, i32
  }
  func.func @transform_1(%arg0: i32) -> (i32, i32) {
    %c0_i32 = arith.constant 0 : i32
    %c0_i32_0 = arith.constant 0 : i32
    %c0_i32_1 = arith.constant 0 : i32
    return %c0_i32, %c0_i32_0 : i32, i32
  }
  func.func @transform_2(%arg0: i32) -> (i32, i32) {
    %c0_i32 = arith.constant 0 : i32
    %c0_i32_0 = arith.constant 0 : i32
    %c0_i32_1 = arith.constant 0 : i32
    return %c0_i32, %c0_i32_0 : i32, i32
  }
  func.func @transform_3(%arg0: i32) -> (i32, i32) {
    %c0_i32 = arith.constant 0 : i32
    %c0_i32_0 = arith.constant 0 : i32
    %c0_i32_1 = arith.constant 0 : i32
    return %c0_i32, %c0_i32_0 : i32, i32
  }
  func.func @transform_4(%arg0: i32) -> (i32, i32) {
    %c0_i32 = arith.constant 0 : i32
    %c0_i32_0 = arith.constant 0 : i32
    return %arg0, %c0_i32 : i32, i32
  }
}

</mosaic_0001>

<bundles_post_ra>
// kernel: neuralnet_forward.1
= control target key start
LH: loop header
LB: loop body
LE: loop exit
PB: predicated region body
PF: predicated region fallthrough
CT: control target
= control target key end

     0   :  { %s1454_s15 = smov 0   ;;  %s1456_s16 = smov 0   ;;  %s1849_s0 = inlined_call_operand.vmem [shape: f32[500,32], index: 0, kind: input, shape index: {}]   ;;  %s1850_s1 = inlined_call_operand.vmem [shape: f32[32,128], index: 1, kind: input, shape index: {}]   ;;  %s1851_s2 = inlined_call_operand.vmem [shape: f32[1,128], index: 2, kind: input, shape index: {}]   ;;  %s1852_s3 = inlined_call_operand.vmem [shape: f32[1,128], index: 3, kind: input, shape index: {}]   ;;  %s1853_s4 = inlined_call_operand.vmem [shape: f32[500,1], index: 4, kind: output, shape index: {}]  }
   0x1   :  { %s1458_s17 = smov 0  }
   0x2 LB: > { %s1467_s18 = sadd.s32 4294967295, %s1395_s17   ;;  %s1469_s19 = sadd.s32 1, %s1395_s17   ;;  %s1395_s17 = sphi %s1458_s17, %s1862_s17   ;;  %s1391_s16 = sphi %s1456_s16, %s1861_s16   ;;  %s1387_s15 = sphi %s1454_s15, %s1860_s15  }
   0x3   : > { %s107_s20 = ssub.s32 %s1395_s17, %s1469_s19  ;;  %s110_s21 = sadd.s32 1, %s1391_s16 }
   0x4   : > { %p108_p0 = scmp.eq.s32.totalorder %s107_s20, 0  ;;  %p120_p1 = scmp.ne.s32.totalorder %s1391_s16, %s1387_s15 }
   0x5   : > { %p121_p2 = scmp.eq.s32.totalorder %s1467_s18, 1  ;;  %p1095_p3 = scmp.ge.s32.totalorder %s1395_s17, 1 }
   0x6   : > { %s1477_s22 = scalar_select %p108_p0, %s1391_s16, %s110_s21  }
   0x7   : > { %p1479_p4 = por %p121_p2, %p120_p1  ;;  %p171_p5 = scmp.lt.s32.totalorder %s1395_s17, 3 }
   0x9   : > { %p172_p6 = pnand %p1095_p3, %p171_p5 }
   0xa   : > { %s1490_s28 = sshll.u32 (!%p172_p6), %s1467_s18, 5  ;;  %s197_s20 = sand.u32 (!%p172_p6), 1, %s1387_s15  }
   0xb   : > { %175 = sbr.rel (%p172_p6) target bundleno = 473 (0x1d9), region = 36  ;;  %p205_p7 = scmp.lt.s32.totalorder (!%p172_p6), %s1490_s28, 62 }
   0xc   : > { %s1096_s21 = sshll.u32 (!%p172_p6), %s197_s20, 8 }
   0xd   : > { %s1644_s24 = scalar_lea.vmem (!%p172_p6), [#allocation2], %s1096_s21  }
  0x10   : > { %v254_v0 = vld [vmem:[%s1850_s1 + $0x18] sm:$0xff]  ;;  %v253_v1 = vld [vmem:[%s1850_s1 + $0x10] sm:$0xff]  ;;  %v252_v2 = vld [vmem:[%s1850_s1 + $0x8] sm:$0xff]  ;;  %s206_s5 = scalar_select %p205_p7, %s1490_s28, 62  ;;  %vm262_vm0 = vcmask 261120   ;;  %vm719_vm1 = vcmask 7168  }
  0x11   : > { %1189 = vmatprep.subr.mxu0 %v254_v0  ;;  %1245 = vmatprep.subr.mxu1 %v254_v0  ;;  %v251_v3 = vld [vmem:[%s1850_s1] sm:$0xff]  ;;  %s760_s15 = ssub.s32 (%p1479_p4), 63, %s1490_s28  ;;  %s1150_s25 = sshll.u32 (%p1479_p4), %s1467_s18, 8 }
  0x12   : > { %1190 = vmatpush3.msra.mxu0 %v254_v0  ;;  %1249 = vmatpush3.msra.mxu1 %v254_v0  ;;  %s1098_s8 = sshll.u32 %s206_s5, 3  ;;  %v1572_v36 = vld [vmem:[%s1851_s2] ss:$0 sm:$0xff]  ;;  %p761_p8 = scmp.lt.s32.totalorder (%p1479_p4), %s760_s15, 32 }
  0x13   : > { %1191 = vmatprep.subr.mxu0 %v253_v1  ;;  %1246 = vmatprep.subr.mxu1 %v253_v1  ;;  %s1503_s11 = scalar_lea.vmem %s1849_s0, %s1098_s8  ;;  %v1580_v46 = vld [vmem:[%s1852_s3] ss:$0 sm:$0xff]  ;;  %s1717_s29 = scalar_lea.vmem (%p1479_p4), %s1853_s4, %s1150_s25  }
  0x14   : > { %1192 = vmatpush3.msra.mxu0 %v253_v1  ;;  %1250 = vmatpush3.msra.mxu1 %v253_v1  ;;  %v219_v4 = vld [vmem:[%s1503_s11] sm:$0xff]  ;;  %v220_v6 = vld [vmem:[%s1503_s11 + $0x8] sm:$0xff]  ;;  %v221_v8 = vld [vmem:[%s1503_s11 + $0x10] sm:$0xff] }
  0x15   : > { %1193 = vmatprep.subr.mxu0 %v252_v2  ;;  %1247 = vmatprep.subr.mxu1 %v252_v2  ;;  %v235_v5 = vld [vmem:[%s1503_s11 + $0x80] sm:$0xff]  ;;  %v236_v7 = vld [vmem:[%s1503_s11 + $0x88] sm:$0xff]  ;;  %v237_v9 = vld [vmem:[%s1503_s11 + $0x90] sm:$0xff] }
  0x16   : > { %1194 = vmatpush3.msra.mxu0 %v252_v2  ;;  %1251 = vmatpush3.msra.mxu1 %v252_v2  ;;  %v222_v10 = vld [vmem:[%s1503_s11 + $0x18] sm:$0xff]  ;;  %v223_v12 = vld [vmem:[%s1503_s11 + $0x20] sm:$0xff]  ;;  %v224_v14 = vld [vmem:[%s1503_s11 + $0x28] sm:$0xff] }
  0x17   : > { %1195 = vmatprep.subr.mxu0 %v251_v3  ;;  %1248 = vmatprep.subr.mxu1 %v251_v3  ;;  %v238_v11 = vld [vmem:[%s1503_s11 + $0x98] sm:$0xff]  ;;  %v239_v13 = vld [vmem:[%s1503_s11 + $0xa0] sm:$0xff]  ;;  %v240_v15 = vld [vmem:[%s1503_s11 + $0xa8] sm:$0xff] }
  0x18   : > { %1196 = vmatpush3.msra.mxu0 %v251_v3  ;;  %1252 = vmatpush3.msra.mxu1 %v251_v3  ;;  %v225_v16 = vld [vmem:[%s1503_s11 + $0x30] sm:$0xff]  ;;  %v226_v18 = vld [vmem:[%s1503_s11 + $0x38] sm:$0xff]  ;;  %v227_v20 = vld [vmem:[%s1503_s11 + $0x40] sm:$0xff] }
  0x19   : > { %1197 = vmatprep.mubr.msk.f32.mxu0 %vm262_vm0, %v219_v4  ;;  %1221 = vmatprep.mubr.msk.f32.mxu1 %vm262_vm0, %v235_v5  ;;  %v241_v17 = vld [vmem:[%s1503_s11 + $0xb0] sm:$0xff]  ;;  %v242_v19 = vld [vmem:[%s1503_s11 + $0xb8] sm:$0xff]  ;;  %v243_v21 = vld [vmem:[%s1503_s11 + $0xc0] sm:$0xff] }
  0x1a   : > { %1198 = vmatmul.mubr.msk.f32.vlgmr.msra.gmra.mxu0 %vm262_vm0, %v220_v6  ;;  %1222 = vmatmul.mubr.msk.f32.vlgmr.msra.gmra.mxu1 %vm262_vm0, %v236_v7  ;;  %v228_v22 = vld [vmem:[%s1503_s11 + $0x48] sm:$0xff]  ;;  %v229_v24 = vld [vmem:[%s1503_s11 + $0x50] sm:$0xff]  ;;  %v230_v26 = vld [vmem:[%s1503_s11 + $0x58] sm:$0xff] }
  0x1b   : > { %1200 = vmatprep.mubr.msk.f32.mxu0 %vm262_vm0, %v221_v8  ;;  %1224 = vmatprep.mubr.msk.f32.mxu1 %vm262_vm0, %v237_v9  ;;  %v244_v23 = vld [vmem:[%s1503_s11 + $0xc8] sm:$0xff]  ;;  %v245_v25 = vld [vmem:[%s1503_s11 + $0xd0] sm:$0xff]  ;;  %v246_v27 = vld [vmem:[%s1503_s11 + $0xd8] sm:$0xff] }
  0x1c   : > { %v231_v28 = vld [vmem:[%s1503_s11 + $0x60] sm:$0xff]  ;;  %v232_v30 = vld [vmem:[%s1503_s11 + $0x68] sm:$0xff]  ;;  %v233_v32 = vld [vmem:[%s1503_s11 + $0x70] sm:$0xff] }
  0x1d   : > { %v247_v29 = vld [vmem:[%s1503_s11 + $0xe0] sm:$0xff]  ;;  %v248_v31 = vld [vmem:[%s1503_s11 + $0xe8] sm:$0xff]  ;;  %v249_v33 = vld [vmem:[%s1503_s11 + $0xf0] sm:$0xff] }
  0x1e   : > { %1201 = vmatmul.mubr.msk.f32.gmra.mxu0 %vm262_vm0, %v222_v10  ;;  %1225 = vmatmul.mubr.msk.f32.gmra.mxu1 %vm262_vm0, %v238_v11  ;;  %v234_v34 = vld [vmem:[%s1503_s11 + $0x78] sm:$0xff] }
  0x1f   : > { %1203 = vmatprep.mubr.msk.f32.mxu0 %vm262_vm0, %v223_v12  ;;  %1227 = vmatprep.mubr.msk.f32.mxu1 %vm262_vm0, %v239_v13  ;;  %v250_v35 = vld [vmem:[%s1503_s11 + $0xf8] sm:$0xff] }
  0x22   : > { %1204 = vmatmul.mubr.msk.f32.gmra.mxu0 %vm262_vm0, %v224_v14  ;;  %1228 = vmatmul.mubr.msk.f32.gmra.mxu1 %vm262_vm0, %v240_v15 }
  0x23   : > { %1206 = vmatprep.mubr.msk.f32.mxu0 %vm262_vm0, %v225_v16  ;;  %1230 = vmatprep.mubr.msk.f32.mxu1 %vm262_vm0, %v241_v17 }
  0x26   : > { %1207 = vmatmul.mubr.msk.f32.gmra.mxu0 %vm262_vm0, %v226_v18  ;;  %1231 = vmatmul.mubr.msk.f32.gmra.mxu1 %vm262_vm0, %v242_v19 }
  0x27   : > { %1209 = vmatprep.mubr.msk.f32.mxu0 %vm262_vm0, %v227_v20  ;;  %1233 = vmatprep.mubr.msk.f32.mxu1 %vm262_vm0, %v243_v21 }
  0x2a   : > { %1210 = vmatmul.mubr.msk.f32.gmra.mxu0 %vm262_vm0, %v228_v22  ;;  %1234 = vmatmul.mubr.msk.f32.gmra.mxu1 %vm262_vm0, %v244_v23 }
  0x2b   : > { %1212 = vmatprep.mubr.msk.f32.mxu0 %vm262_vm0, %v229_v24  ;;  %1236 = vmatprep.mubr.msk.f32.mxu1 %vm262_vm0, %v245_v25 }
  0x2e   : > { %1213 = vmatmul.mubr.msk.f32.gmra.mxu0 %vm262_vm0, %v230_v26  ;;  %1237 = vmatmul.mubr.msk.f32.gmra.mxu1 %vm262_vm0, %v246_v27 }
  0x2f   : > { %1215 = vmatprep.mubr.msk.f32.mxu0 %vm262_vm0, %v231_v28  ;;  %1239 = vmatprep.mubr.msk.f32.mxu1 %vm262_vm0, %v247_v29 }
  0x32   : > { %1216 = vmatmul.mubr.msk.f32.gmra.mxu0 %vm262_vm0, %v232_v30  ;;  %1240 = vmatmul.mubr.msk.f32.gmra.mxu1 %vm262_vm0, %v248_v31 }
  0x33   : > { %1218 = vmatprep.mubr.msk.f32.mxu0 %vm262_vm0, %v233_v32  ;;  %1242 = vmatprep.mubr.msk.f32.mxu1 %vm262_vm0, %v249_v33 }
  0x36   : > { %1219 = vmatmul.mubr.msk.f32.gmra.mxu0 %vm262_vm0, %v234_v34  ;;  %1243 = vmatmul.mubr.msk.f32.gmra.mxu1 %vm262_vm0, %v250_v35 }
  0xda   : > { %v1199_v37 = vpop.f32.mrf.mxu0  ;;  %v1223_v38 = vpop.f32.mrf.mxu1 }
  0xdb   : > { %v431_v39 = vadd.f32 %v1199_v37, %v1572_v36  ;;  %v511_v40 = vadd.f32 %v1223_v38, %v1572_v36 }
  0xdc   : > { %v425_v41 = vpop.f32.mrf.mxu0  ;;  %v505_v42 = vpop.f32.mrf.mxu1 }
  0xdd   : > { %v585_v43 = vmax.f32 %v431_v39, 0.0  ;;  %v601_v44 = vmax.f32 %v511_v40, 0.0  ;;  %v426_v45 = vadd.f32 %v1572_v36, %v425_v41  ;;  %v506_v49 = vadd.f32 %v1572_v36, %v505_v42 }
  0xde   : > { %v1202_v47 = vpop.f32.mrf.mxu0  ;;  %v1226_v48 = vpop.f32.mrf.mxu1 }
  0xdf   : > { %v441_v50 = vadd.f32 %v1202_v47, %v1572_v36  ;;  %v521_v51 = vadd.f32 %v1226_v48, %v1572_v36  ;;  %v584_v52 = vmax.f32 %v426_v45, 0.0  ;;  %v640_v54 = vmul.f32 %v1580_v46, %v601_v44 }
  0xe0   : > { %v435_v53 = vpop.f32.mrf.mxu0  ;;  %v624_v55 = vmul.f32 %v1580_v46, %v585_v43  ;;  %v515_v57 = vpop.f32.mrf.mxu1  ;;  %v600_v60 = vmax.f32 %v506_v49, 0.0 }
  0xe1   : > { %v587_v56 = vmax.f32 %v441_v50, 0.0  ;;  %v603_v58 = vmax.f32 %v521_v51, 0.0  ;;  %689 = vadd.xlane.f32.xlu1 %v640_v54  ;;  %v436_v62 = vadd.f32 %v1572_v36, %v435_v53  ;;  %v516_v63 = vadd.f32 %v1572_v36, %v515_v57 }
  0xe2   : > { %657 = vadd.xlane.f32.xlu0 %v624_v55  ;;  %v1205_v59 = vpop.f32.mrf.mxu0  ;;  %v623_v0 = vmul.f32 %v1580_v46, %v584_v52  ;;  %v1229_v1 = vpop.f32.mrf.mxu1  ;;  %v639_v4 = vmul.f32 %v1580_v46, %v600_v60 }
  0xe3   : > { %v626_v61 = vmul.f32 %v1580_v46, %v587_v56  ;;  %v642_v3 = vmul.f32 %v1580_v46, %v603_v58  ;;  %v586_v5 = vmax.f32 %v436_v62, 0.0  ;;  %v602_v6 = vmax.f32 %v516_v63, 0.0 }
  0xe4   : > { %v445_v2 = vpop.f32.mrf.mxu0  ;;  %v451_v7 = vadd.f32 %v1205_v59, %v1572_v36  ;;  %v525_v9 = vpop.f32.mrf.mxu1  ;;  %v531_v11 = vadd.f32 %v1229_v1, %v1572_v36 }
  0xe5   : > { %661 = vadd.xlane.f32.xlu1 %v626_v61  ;;  %v446_v8 = vadd.f32 %v1572_v36, %v445_v2  ;;  %v526_v12 = vadd.f32 %v1572_v36, %v525_v9  ;;  %v625_v15 = vmul.f32 %v1580_v46, %v586_v5  ;;  %v641_v16 = vmul.f32 %v1580_v46, %v602_v6 }
  0xe6   : > { %655 = vadd.xlane.f32.xlu0 %v623_v0  ;;  %v1208_v10 = vpop.f32.mrf.mxu0  ;;  %v589_v13 = vmax.f32 %v451_v7, 0.0  ;;  %v1232_v17 = vpop.f32.mrf.mxu1  ;;  %v605_v19 = vmax.f32 %v531_v11, 0.0 }
  0xe7   : > { %v588_v14 = vmax.f32 %v446_v8, 0.0  ;;  %v604_v20 = vmax.f32 %v526_v12, 0.0  ;;  %v461_v21 = vadd.f32 %v1208_v10, %v1572_v36  ;;  %v541_v27 = vadd.f32 %v1232_v17, %v1572_v36 }
  0xe8   : > { %v455_v18 = vpop.f32.mrf.mxu0  ;;  %v628_v23 = vmul.f32 %v1580_v46, %v589_v13  ;;  %v535_v25 = vpop.f32.mrf.mxu1  ;;  %v644_v31 = vmul.f32 %v1580_v46, %v605_v19 }
  0xe9   : > { %693 = vadd.xlane.f32.xlu1 %v642_v3  ;;  %v456_v22 = vadd.f32 %v1572_v36, %v455_v18  ;;  %v627_v24 = vmul.f32 %v1580_v46, %v588_v14  ;;  %v536_v28 = vadd.f32 %v1572_v36, %v535_v25  ;;  %v591_v29 = vmax.f32 %v461_v21, 0.0 }
  0xea   : > { %687 = vadd.xlane.f32.xlu0 %v639_v4  ;;  %v1211_v26 = vpop.f32.mrf.mxu0  ;;  %v643_v32 = vmul.f32 %v1580_v46, %v604_v20  ;;  %v1235_v33 = vpop.f32.mrf.mxu1  ;;  %v607_v35 = vmax.f32 %v541_v27, 0.0 }
  0xeb   : > { %v590_v30 = vmax.f32 %v456_v22, 0.0  ;;  %v606_v37 = vmax.f32 %v536_v28, 0.0  ;;  %v471_v38 = vadd.f32 %v1211_v26, %v1572_v36  ;;  %v630_v40 = vmul.f32 %v1580_v46, %v591_v29 }
  0xec   : > { %v465_v34 = vpop.f32.mrf.mxu0  ;;  %v545_v42 = vpop.f32.mrf.mxu1  ;;  %v551_v44 = vadd.f32 %v1235_v33, %v1572_v36  ;;  %v646_v49 = vmul.f32 %v1580_v46, %v607_v35 }
  0xed   : > { %659 = vadd.xlane.f32.xlu1 %v625_v15  ;;  %v466_v39 = vadd.f32 %v1572_v36, %v465_v34  ;;  %v629_v41 = vmul.f32 %v1580_v46, %v590_v30  ;;  %v546_v45 = vadd.f32 %v1572_v36, %v545_v42  ;;  %v593_v47 = vmax.f32 %v471_v38, 0.0 }
  0xee   : > { %691 = vadd.xlane.f32.xlu0 %v641_v16  ;;  %v1214_v43 = vpop.f32.mrf.mxu0  ;;  %v645_v50 = vmul.f32 %v1580_v46, %v606_v37  ;;  %v1238_v51 = vpop.f32.mrf.mxu1  ;;  %v609_v53 = vmax.f32 %v551_v44, 0.0 }
  0xef   : > { %v592_v48 = vmax.f32 %v466_v39, 0.0  ;;  %v608_v54 = vmax.f32 %v546_v45, 0.0  ;;  %v481_v55 = vadd.f32 %v1214_v43, %v1572_v36  ;;  %v632_v57 = vmul.f32 %v1580_v46, %v593_v47 }
  0xf0   : > { %v475_v52 = vpop.f32.mrf.mxu0  ;;  %v555_v59 = vpop.f32.mrf.mxu1  ;;  %v561_v61 = vadd.f32 %v1238_v51, %v1572_v36  ;;  %v648_v1 = vmul.f32 %v1580_v46, %v609_v53 }
  0xf1   : > { %665 = vadd.xlane.f32.xlu1 %v628_v23  ;;  %v476_v56 = vadd.f32 %v1572_v36, %v475_v52  ;;  %v631_v58 = vmul.f32 %v1580_v46, %v592_v48  ;;  %v556_v62 = vadd.f32 %v1572_v36, %v555_v59  ;;  %v595_v63 = vmax.f32 %v481_v55, 0.0 }
  0xf2   : > { %663 = vadd.xlane.f32.xlu0 %v627_v24  ;;  %v1217_v60 = vpop.f32.mrf.mxu0  ;;  %v647_v2 = vmul.f32 %v1580_v46, %v608_v54  ;;  %v1241_v3 = vpop.f32.mrf.mxu1  ;;  %v611_v5 = vmax.f32 %v561_v61, 0.0 }
  0xf3   : > { %v594_v0 = vmax.f32 %v476_v56, 0.0  ;;  %v610_v6 = vmax.f32 %v556_v62, 0.0  ;;  %v491_v7 = vadd.f32 %v1217_v60, %v1572_v36  ;;  %v634_v9 = vmul.f32 %v1580_v46, %v595_v63 }
  0xf4   : > { %v485_v4 = vpop.f32.mrf.mxu0  ;;  %v565_v11 = vpop.f32.mrf.mxu1  ;;  %v571_v13 = vadd.f32 %v1241_v3, %v1572_v36  ;;  %v650_v17 = vmul.f32 %v1580_v46, %v611_v5 }
  0xf5   : > { %697 = vadd.xlane.f32.xlu1 %v644_v31  ;;  %v486_v8 = vadd.f32 %v1572_v36, %v485_v4  ;;  %v633_v10 = vmul.f32 %v1580_v46, %v594_v0  ;;  %v566_v14 = vadd.f32 %v1572_v36, %v565_v11  ;;  %v597_v15 = vmax.f32 %v491_v7, 0.0 }
  0xf6   : > { %695 = vadd.xlane.f32.xlu0 %v643_v32  ;;  %v1220_v12 = vpop.f32.mrf.mxu0  ;;  %v649_v18 = vmul.f32 %v1580_v46, %v610_v6  ;;  %v1244_v20 = vpop.f32.mrf.mxu1  ;;  %v613_v21 = vmax.f32 %v571_v13, 0.0 }
  0xf7   : > { %v596_v16 = vmax.f32 %v486_v8, 0.0  ;;  %v612_v22 = vmax.f32 %v566_v14, 0.0  ;;  %v501_v23 = vadd.f32 %v1220_v12, %v1572_v36  ;;  %v636_v25 = vmul.f32 %v1580_v46, %v597_v15 }
  0xf8   : > { %v495_v19 = vpop.f32.mrf.mxu0  ;;  %v575_v27 = vpop.f32.mrf.mxu1  ;;  %v581_v28 = vadd.f32 %v1244_v20, %v1572_v36  ;;  %v652_v29 = vmul.f32 %v1580_v46, %v613_v21 }
  0xf9   : > { %669 = vadd.xlane.f32.xlu1 %v630_v40  ;;  %v496_v24 = vadd.f32 %v1572_v36, %v495_v19  ;;  %v635_v26 = vmul.f32 %v1580_v46, %v596_v16  ;;  %v599_v30 = vmax.f32 %v501_v23, 0.0  ;;  %v576_v32 = vadd.f32 %v1572_v36, %v575_v27 }
  0xfa   : > { %667 = vadd.xlane.f32.xlu0 %v629_v41  ;;  %v651_v33 = vmul.f32 %v1580_v46, %v612_v22  ;;  %v615_v34 = vmax.f32 %v581_v28, 0.0 }
  0xfb   : > { %v598_v31 = vmax.f32 %v496_v24, 0.0  ;;  %v614_v35 = vmax.f32 %v576_v32, 0.0  ;;  %v638_v37 = vmul.f32 %v1580_v46, %v599_v30 }
  0xfc   : > { %v654_v39 = vmul.f32 %v1580_v46, %v615_v34 }
  0xfd   : > { %701 = vadd.xlane.f32.xlu1 %v646_v49  ;;  %v637_v38 = vmul.f32 %v1580_v46, %v598_v31  ;;  %v653_v40 = vmul.f32 %v1580_v46, %v614_v35 }
  0xfe   : > { %699 = vadd.xlane.f32.xlu0 %v645_v50 }
 0x101   : > { %673 = vadd.xlane.f32.xlu1 %v632_v57 }
 0x102   : > { %671 = vadd.xlane.f32.xlu0 %v631_v58 }
 0x105   : > { %705 = vadd.xlane.f32.xlu1 %v648_v1 }
 0x106   : > { %703 = vadd.xlane.f32.xlu0 %v647_v2 }
 0x109   : > { %677 = vadd.xlane.f32.xlu1 %v634_v9 }
 0x10a   : > { %675 = vadd.xlane.f32.xlu0 %v633_v10 }
 0x10d   : > { %709 = vadd.xlane.f32.xlu1 %v650_v17 }
 0x10e   : > { %707 = vadd.xlane.f32.xlu0 %v649_v18 }
 0x111   : > { %681 = vadd.xlane.f32.xlu1 %v636_v25 }
 0x112   : > { %679 = vadd.xlane.f32.xlu0 %v635_v26 }
 0x115   : > { %713 = vadd.xlane.f32.xlu1 %v652_v29 }
 0x116   : > { %711 = vadd.xlane.f32.xlu0 %v651_v33 }
 0x119   : > { %685 = vadd.xlane.f32.xlu1 %v638_v37 }
 0x11a   : > { %683 = vadd.xlane.f32.xlu0 %v637_v38 }
 0x11d   : > { %717 = vadd.xlane.f32.xlu1 %v654_v39 }
 0x11e   : > { %715 = vadd.xlane.f32.xlu0 %v653_v40 }
 0x16a   : > { %v690_v36 = vpop.xlane.xlu1 %689 }
 0x16b   : > { %v658_v41 = vpop.xlane.xlu0 %657  ;;  %737 = vst.msk [vmem:[%s1644_s24 + $0x88] sm:$0xff] %vm719_vm1, %v690_v36 }
 0x16c   : > { %721 = vst.msk [vmem:[%s1644_s24 + $0x8] sm:$0xff] %vm719_vm1, %v658_v41 }
 0x16e   : > { %v662_v46 = vpop.xlane.xlu1 %661 }
 0x16f   : > { %v656_v42 = vpop.xlane.xlu0 %655  ;;  %723 = vst.msk [vmem:[%s1644_s24 + $0x18] sm:$0xff] %vm719_vm1, %v662_v46 }
 0x170   : > { %720 = vst.msk [vmem:[%s1644_s24] sm:$0xff] %vm719_vm1, %v656_v42 }
 0x172   : > { %v694_v43 = vpop.xlane.xlu1 %693 }
 0x173   : > { %v688_v44 = vpop.xlane.xlu0 %687  ;;  %739 = vst.msk [vmem:[%s1644_s24 + $0x98] sm:$0xff] %vm719_vm1, %v694_v43 }
 0x174   : > { %736 = vst.msk [vmem:[%s1644_s24 + $0x80] sm:$0xff] %vm719_vm1, %v688_v44 }
 0x176   : > { %v660_v45 = vpop.xlane.xlu1 %659 }
 0x177   : > { %v692_v47 = vpop.xlane.xlu0 %691  ;;  %722 = vst.msk [vmem:[%s1644_s24 + $0x10] sm:$0xff] %vm719_vm1, %v660_v45 }
 0x178   : > { %738 = vst.msk [vmem:[%s1644_s24 + $0x90] sm:$0xff] %vm719_vm1, %v692_v47 }
 0x17a   : > { %v666_v48 = vpop.xlane.xlu1 %665 }
 0x17b   : > { %v664_v49 = vpop.xlane.xlu0 %663  ;;  %725 = vst.msk [vmem:[%s1644_s24 + $0x28] sm:$0xff] %vm719_vm1, %v666_v48 }
 0x17c   : > { %724 = vst.msk [vmem:[%s1644_s24 + $0x20] sm:$0xff] %vm719_vm1, %v664_v49 }
 0x17e   : > { %v698_v50 = vpop.xlane.xlu1 %697 }
 0x17f   : > { %v696_v51 = vpop.xlane.xlu0 %695  ;;  %741 = vst.msk [vmem:[%s1644_s24 + $0xa8] sm:$0xff] %vm719_vm1, %v698_v50 }
 0x180   : > { %740 = vst.msk [vmem:[%s1644_s24 + $0xa0] sm:$0xff] %vm719_vm1, %v696_v51 }
 0x182   : > { %v670_v52 = vpop.xlane.xlu1 %669 }
 0x183   : > { %v668_v53 = vpop.xlane.xlu0 %667  ;;  %727 = vst.msk [vmem:[%s1644_s24 + $0x38] sm:$0xff] %vm719_vm1, %v670_v52 }
 0x184   : > { %726 = vst.msk [vmem:[%s1644_s24 + $0x30] sm:$0xff] %vm719_vm1, %v668_v53 }
 0x186   : > { %v702_v54 = vpop.xlane.xlu1 %701 }
 0x187   : > { %v700_v55 = vpop.xlane.xlu0 %699  ;;  %743 = vst.msk [vmem:[%s1644_s24 + $0xb8] sm:$0xff] %vm719_vm1, %v702_v54 }
 0x188   : > { %742 = vst.msk [vmem:[%s1644_s24 + $0xb0] sm:$0xff] %vm719_vm1, %v700_v55 }
 0x18a   : > { %v674_v56 = vpop.xlane.xlu1 %673 }
 0x18b   : > { %v672_v57 = vpop.xlane.xlu0 %671  ;;  %729 = vst.msk [vmem:[%s1644_s24 + $0x48] sm:$0xff] %vm719_vm1, %v674_v56 }
 0x18c   : > { %728 = vst.msk [vmem:[%s1644_s24 + $0x40] sm:$0xff] %vm719_vm1, %v672_v57 }
 0x18e   : > { %v706_v58 = vpop.xlane.xlu1 %705 }
 0x18f   : > { %v704_v59 = vpop.xlane.xlu0 %703  ;;  %745 = vst.msk [vmem:[%s1644_s24 + $0xc8] sm:$0xff] %vm719_vm1, %v706_v58 }
 0x190   : > { %744 = vst.msk [vmem:[%s1644_s24 + $0xc0] sm:$0xff] %vm719_vm1, %v704_v59 }
 0x192   : > { %v678_v60 = vpop.xlane.xlu1 %677 }
 0x193   : > { %v676_v61 = vpop.xlane.xlu0 %675  ;;  %731 = vst.msk [vmem:[%s1644_s24 + $0x58] sm:$0xff] %vm719_vm1, %v678_v60 }
 0x194   : > { %730 = vst.msk [vmem:[%s1644_s24 + $0x50] sm:$0xff] %vm719_vm1, %v676_v61 }
 0x196   : > { %v710_v62 = vpop.xlane.xlu1 %709 }
 0x197   : > { %v708_v63 = vpop.xlane.xlu0 %707  ;;  %747 = vst.msk [vmem:[%s1644_s24 + $0xd8] sm:$0xff] %vm719_vm1, %v710_v62 }
 0x198   : > { %746 = vst.msk [vmem:[%s1644_s24 + $0xd0] sm:$0xff] %vm719_vm1, %v708_v63 }
 0x19a   : > { %v682_v0 = vpop.xlane.xlu1 %681 }
 0x19b   : > { %v680_v1 = vpop.xlane.xlu0 %679  ;;  %733 = vst.msk [vmem:[%s1644_s24 + $0x68] sm:$0xff] %vm719_vm1, %v682_v0 }
 0x19c   : > { %732 = vst.msk [vmem:[%s1644_s24 + $0x60] sm:$0xff] %vm719_vm1, %v680_v1 }
 0x19e   : > { %v714_v2 = vpop.xlane.xlu1 %713 }
 0x19f   : > { %v712_v3 = vpop.xlane.xlu0 %711  ;;  %749 = vst.msk [vmem:[%s1644_s24 + $0xe8] sm:$0xff] %vm719_vm1, %v714_v2 }
 0x1a0   : > { %748 = vst.msk [vmem:[%s1644_s24 + $0xe0] sm:$0xff] %vm719_vm1, %v712_v3 }
 0x1a2   : > { %v686_v4 = vpop.xlane.xlu1 %685 }
 0x1a3   : > { %v684_v5 = vpop.xlane.xlu0 %683  ;;  %735 = vst.msk [vmem:[%s1644_s24 + $0x78] sm:$0xff] %vm719_vm1, %v686_v4 }
 0x1a4   : > { %734 = vst.msk [vmem:[%s1644_s24 + $0x70] sm:$0xff] %vm719_vm1, %v684_v5  ;;  %758 = sbr.rel (!%p1479_p4) target bundleno = 473 (0x1d9), region = 40 }
 0x1a6   : > { %v718_v6 = vpop.xlane.xlu1 %717 }
 0x1a7   : > { %v716_v7 = vpop.xlane.xlu0 %715  ;;  %751 = vst.msk [vmem:[%s1644_s24 + $0xf8] sm:$0xff] %vm719_vm1, %v718_v6 }
 0x1a8   : > { %750 = vst.msk [vmem:[%s1644_s24 + $0xf0] sm:$0xff] %vm719_vm1, %v716_v7 }
 0x1a9   : > { %s1864_s15 = smov (!%p761_p8, %s760_s15), 32 }
 0x1aa   : > { %s1135_s30 = sshll.u32 %s1864_s15, 7 }
 0x1ab   : > { %p1138_p9 = scmp.eq.s32.totalorder %s1135_s30, 0 }
 0x1ac   : > { %s1723_s5 = sshrl.u32 (!%p1138_p9), %s1864_s15, 5 }
 0x1ad   : > { %769 = sbr.rel (%p1138_p9) target bundleno = 473 (0x1d9), region = 44  ;;  %p1139_p10 = scmp.le.s32.totalorder (!%p1138_p9), %s1723_s5, 0 }
 0x1b2   : > { %1048 = sbr.rel (%p1139_p10) target bundleno = 456 (0x1c8), region = 120  ;;  %s1855_s18 = smov (!%p1139_p10), %s1717_s29 }
 0x1b3   : > { %s1856_s23 = smov (!%p1139_p10), %s1644_s24  ;;  %s1732_s28 = smov (!%p1139_p10), 0  }
 0x1b4   : > { %s1734_s6 = smov (!%p1139_p10), 0  }
 0x1b7 LB: >> { %v894_v8 = vld [vmem:[%s1403_s23] sm:$0xff]  ;;  %v896_v9 = vld [vmem:[%s1403_s23 + $0x8] sm:$0xff]  ;;  %v898_v10 = vld [vmem:[%s1403_s23 + $0x10] sm:$0xff]  ;;  %s958_s7 = sadd.s32 1, %s1407_s28  ;;  %s888_s6 = sadd.s32 1, %s1411_s6   ;;  %s1411_s6 = sphi %s1734_s6, %s888_s6   ;;  %s1407_s28 = sphi %s1732_s28, %s1859_s28   ;;  %s1403_s23 = sphi %s1856_s23, %s1858_s23   ;;  %s1399_s18 = sphi %s1855_s18, %s1857_s18  }
 0x1b8   : >> { %895 = vst [vmem:[%s1399_s18] sm:$0xff] %v894_v8  ;;  %897 = vst [vmem:[%s1399_s18 + $0x8] sm:$0xff] %v896_v9  ;;  %v900_v11 = vld [vmem:[%s1403_s23 + $0x18] sm:$0xff]  ;;  %v902_v12 = vld [vmem:[%s1403_s23 + $0x20] sm:$0xff]  ;;  %p959_p11 = scmp.ge.s32.totalorder %s958_s7, %s1723_s5  ;;  %p887_p12 = scmp.ge.s32.totalorder %s888_s6, %s1723_s5 }
 0x1b9   : >> { %899 = vst [vmem:[%s1399_s18 + $0x10] sm:$0xff] %v898_v10  ;;  %v904_v13 = vld [vmem:[%s1403_s23 + $0x28] sm:$0xff]  ;;  %901 = vst [vmem:[%s1399_s18 + $0x18] sm:$0xff] %v900_v11  ;;  %v906_v14 = vld [vmem:[%s1403_s23 + $0x30] sm:$0xff] }
 0x1ba   : >> { %903 = vst [vmem:[%s1399_s18 + $0x20] sm:$0xff] %v902_v12  ;;  %905 = vst [vmem:[%s1399_s18 + $0x28] sm:$0xff] %v904_v13  ;;  %v908_v15 = vld [vmem:[%s1403_s23 + $0x38] sm:$0xff]  ;;  %v910_v16 = vld [vmem:[%s1403_s23 + $0x40] sm:$0xff]  ;;  %s1866_s7 = smov (%p959_p11, %s958_s7), 0 }
 0x1bb   : >> { %907 = vst [vmem:[%s1399_s18 + $0x30] sm:$0xff] %v906_v14  ;;  %909 = vst [vmem:[%s1399_s18 + $0x38] sm:$0xff] %v908_v15  ;;  %v912_v17 = vld [vmem:[%s1403_s23 + $0x48] sm:$0xff]  ;;  %v914_v18 = vld [vmem:[%s1403_s23 + $0x50] sm:$0xff]  ;;  %s1140_s8 = sshll.u32 %s1866_s7, 8  ;;  %s1859_s28 = smov %s1866_s7 }
 0x1bc   : >> { %911 = vst [vmem:[%s1399_s18 + $0x40] sm:$0xff] %v910_v16  ;;  %v916_v19 = vld [vmem:[%s1403_s23 + $0x58] sm:$0xff]  ;;  %913 = vst [vmem:[%s1399_s18 + $0x48] sm:$0xff] %v912_v17  ;;  %v918_v20 = vld [vmem:[%s1403_s23 + $0x60] sm:$0xff]  ;;  %s1790_s9 = scalar_lea.vmem %s1644_s24, %s1140_s8 [#allocation2]   ;;  %s964_s10 = scalar_lea.vmem %s1717_s29, %s1140_s8  }
 0x1bd   : >> { %915 = vst [vmem:[%s1399_s18 + $0x50] sm:$0xff] %v914_v18  ;;  %917 = vst [vmem:[%s1399_s18 + $0x58] sm:$0xff] %v916_v19  ;;  %v920_v21 = vld [vmem:[%s1403_s23 + $0x68] sm:$0xff]  ;;  %v922_v22 = vld [vmem:[%s1403_s23 + $0x70] sm:$0xff] }
 0x1be   : >> { %919 = vst [vmem:[%s1399_s18 + $0x60] sm:$0xff] %v918_v20  ;;  %921 = vst [vmem:[%s1399_s18 + $0x68] sm:$0xff] %v920_v21  ;;  %v924_v23 = vld [vmem:[%s1403_s23 + $0x78] sm:$0xff]  ;;  %v926_v24 = vld [vmem:[%s1403_s23 + $0x80] sm:$0xff] }
 0x1bf   : >> { %923 = vst [vmem:[%s1399_s18 + $0x70] sm:$0xff] %v922_v22  ;;  %v928_v25 = vld [vmem:[%s1403_s23 + $0x88] sm:$0xff]  ;;  %925 = vst [vmem:[%s1399_s18 + $0x78] sm:$0xff] %v924_v23  ;;  %v930_v26 = vld [vmem:[%s1403_s23 + $0x90] sm:$0xff] }
 0x1c0   : >> { %927 = vst [vmem:[%s1399_s18 + $0x80] sm:$0xff] %v926_v24  ;;  %929 = vst [vmem:[%s1399_s18 + $0x88] sm:$0xff] %v928_v25  ;;  %v932_v27 = vld [vmem:[%s1403_s23 + $0x98] sm:$0xff]  ;;  %v934_v28 = vld [vmem:[%s1403_s23 + $0xa0] sm:$0xff] }
 0x1c1   : >> { %931 = vst [vmem:[%s1399_s18 + $0x90] sm:$0xff] %v930_v26  ;;  %933 = vst [vmem:[%s1399_s18 + $0x98] sm:$0xff] %v932_v27  ;;  %v936_v29 = vld [vmem:[%s1403_s23 + $0xa8] sm:$0xff]  ;;  %v938_v30 = vld [vmem:[%s1403_s23 + $0xb0] sm:$0xff] }
 0x1c2   : >> { %935 = vst [vmem:[%s1399_s18 + $0xa0] sm:$0xff] %v934_v28  ;;  %v940_v31 = vld [vmem:[%s1403_s23 + $0xb8] sm:$0xff]  ;;  %937 = vst [vmem:[%s1399_s18 + $0xa8] sm:$0xff] %v936_v29  ;;  %v942_v32 = vld [vmem:[%s1403_s23 + $0xc0] sm:$0xff] }
 0x1c3   : >> { %939 = vst [vmem:[%s1399_s18 + $0xb0] sm:$0xff] %v938_v30  ;;  %941 = vst [vmem:[%s1399_s18 + $0xb8] sm:$0xff] %v940_v31  ;;  %v944_v33 = vld [vmem:[%s1403_s23 + $0xc8] sm:$0xff]  ;;  %v946_v34 = vld [vmem:[%s1403_s23 + $0xd0] sm:$0xff]  ;;  %890 = sbr.rel (!%p887_p12) target bundleno = 439 (0x1b7), region = 126 }
 0x1c4   : >> { %943 = vst [vmem:[%s1399_s18 + $0xc0] sm:$0xff] %v942_v32  ;;  %945 = vst [vmem:[%s1399_s18 + $0xc8] sm:$0xff] %v944_v33  ;;  %v948_v35 = vld [vmem:[%s1403_s23 + $0xd8] sm:$0xff]  ;;  %v950_v37 = vld [vmem:[%s1403_s23 + $0xe0] sm:$0xff] }
 0x1c5   : >> { %947 = vst [vmem:[%s1399_s18 + $0xd0] sm:$0xff] %v946_v34  ;;  %v952_v38 = vld [vmem:[%s1403_s23 + $0xe8] sm:$0xff]  ;;  %949 = vst [vmem:[%s1399_s18 + $0xd8] sm:$0xff] %v948_v35  ;;  %v954_v39 = vld [vmem:[%s1403_s23 + $0xf0] sm:$0xff] }
 0x1c6   : >> { %951 = vst [vmem:[%s1399_s18 + $0xe0] sm:$0xff] %v950_v37  ;;  %953 = vst [vmem:[%s1399_s18 + $0xe8] sm:$0xff] %v952_v38  ;;  %v956_v40 = vld [vmem:[%s1403_s23 + $0xf8] sm:$0xff]  ;;  %s1858_s23 = smov %s1790_s9 }
 0x1c7   : >> { %955 = vst [vmem:[%s1399_s18 + $0xf0] sm:$0xff] %v954_v39  ;;  %957 = vst [vmem:[%s1399_s18 + $0xf8] sm:$0xff] %v956_v40  ;;  %s1857_s18 = smov %s964_s10 }
 0x1c8 PF: > { %s1831_s11 = sand.u32 31, %s1864_s15   ;;  %s1151_s12 = sshll.u32 %s1723_s5, 8 }
 0x1c9   : > { %s969_s13 = scalar_lea.vmem %s1644_s24, %s1151_s12 [#allocation2]   ;;  %s971_s14 = scalar_lea.vmem %s1717_s29, %s1151_s12  }
 0x1ca   : > { %p1145_p13 = scmp.le.s32.totalorder %s1831_s11, 0 }
 0x1cb   : > { %s1413_s17 = smov (!%p1145_p13), %s971_s14   ;;  %s1417_s20 = smov (!%p1145_p13), %s969_s13  }
 0x1cc   : > { %1062 = sbr.rel (%p1145_p13) target bundleno = 473 (0x1d9), region = 131  ;;  %s1421_s21 = smov (!%p1145_p13), 0  }
 0x1cd   : > { %s1425_s25 = smov (!%p1145_p13), 0  }
 0x1d1 LB: >> { %v981_v36 = vld [vmem:[%s1419_s20] sm:$0xff]  ;;  %s983_s15 = sadd.s32 1, %s1423_s21  ;;  %s975_s25 = sadd.s32 1, %s1427_s25   ;;  %s1427_s25 = sphi %s1425_s25, %s975_s25   ;;  %s1423_s21 = sphi %s1421_s21, %s1422_s21   ;;  %s1419_s20 = sphi %s1417_s20, %s988_s20   ;;  %s1415_s17 = sphi %s1413_s17, %s989_s17  }
 0x1d2   : >> { %982 = vst [vmem:[%s1415_s17] sm:$0xff] %v981_v36  ;;  %p984_p0 = scmp.ge.s32.totalorder %s983_s15, %s1831_s11  ;;  %p974_p1 = scmp.ge.s32.totalorder %s975_s25, %s1831_s11 }
 0x1d4   : >> { %s1868_s15 = smov (%p984_p0, %s983_s15), 0  ;;  %977 = sbr.rel (!%p974_p1) target bundleno = 465 (0x1d1), region = 137 }
 0x1d5   : >> { %s1146_s24 = sshll.u32 %s1868_s15, 3  ;;  %s1422_s21 = smov %s1868_s15  }
 0x1d6   : >> { %s988_s20 = scalar_lea.vmem %s969_s13, %s1146_s24 [#allocation2]   ;;  %s989_s17 = scalar_lea.vmem %s971_s14, %s1146_s24  }
 0x1d9 PF: > { %p11_p2 = scmp.ge.s32.totalorder %s1469_s19, 4   ;;  %s1860_s15 = smov %s1391_s16 }
 0x1da   : > { %s1861_s16 = smov %s1477_s22  ;;  %s1862_s17 = smov %s1469_s19 }
 0x1db   :  { %13 = sbr.rel (!%p11_p2) target bundleno = 2 (0x2), region = 148 }

</bundles_post_ra>
